<compile_context>
chip_gen: v7x
topology: tpu7x:2x2x1
jax: 0.10.0
libtpu: 0.0.40
codegen_flags: <defaults>
</compile_context>

<pallas_src>
import jax
import jax.numpy as jnp
from jax import lax
from jax.experimental import pallas as pl
from jax.experimental.pallas import tpu as pltpu

_EPS = 1e-12  # F.normalize default eps
_LANE = 128


def _rmsnorm_kernel(x_ref, w_ref, o_ref, *, scale, native_out_path):
    # x_ref: (tile_rows, dim_p) block, w_ref: (1, dim_p), o_ref: (tile_rows, dim_p)
    x = x_ref[...]
    xf = x.astype(jnp.float32)
    # sum of squares per row (always accumulated in f32 for accuracy);
    # clamping sumsq at eps^2 == clamping ||x|| at eps.
    sumsq = jnp.sum(xf * xf, axis=-1, keepdims=True)          # (tile_rows, 1)
    # rsqrt goes to the EUP slot; fold `scale` into the per-row scalar.
    inv = scale * lax.rsqrt(jnp.maximum(sumsq, _EPS * _EPS))  # (tile_rows, 1) f32
    if native_out_path:
        # v6e/v7x bf16-capable VALUs: keep the two full-width multiplies in the
        # I/O dtype; only the per-row scalar is cast down.
        o_ref[...] = ((x * w_ref[...]) * inv.astype(x.dtype)).astype(o_ref.dtype)
    else:
        w = w_ref[...].astype(jnp.float32)                     # broadcasts over rows
        o_ref[...] = (xf * inv * w).astype(o_ref.dtype)


def _round_up(n, m):
    return ((n + m - 1) // m) * m


def _device_kind():
    try:
        return jax.devices()[0].device_kind.lower()
    except Exception:
        return ""


def _vmem_capacity_bytes():
    cap = None
    try:
        info = pltpu.get_tpu_info()
        cap = getattr(info, "vmem_capacity_bytes", None)
    except Exception:
        cap = None
    if not cap:
        cap = 64 * 1024 * 1024  # conservative default (v7x per-TC VMEM)
    cap = int(cap)
    # Guard against the info call reporting per-chip instead of per-TC on v7x.
    if "v7" in _device_kind():
        cap = min(cap, 64 * 1024 * 1024)
    return min(cap, 128 * 1024 * 1024)


def _supports_native_bf16_valu():
    # v6e / v7x VALUs are bf16-capable; v5e (and earlier) are not.
    kind = _device_kind()
    return ("v6" in kind) or ("v7" in kind)


def _choose_tile_rows(rows, dim_p, io_bytes, vmem_cap, sublane):
    # Live per block row: 2x double-buffered input + 2x output in the I/O dtype,
    # plus ~2 f32-width temporaries (x*x for the reduction, pre-cast output).
    per_row = 4 * dim_p * io_bytes + 2 * dim_p * 4
    budget = vmem_cap // 3          # headroom for fixed scratch / regalloc spill
    tile = budget // max(per_row, 1)
    tile = max(sublane, min(4096, int(tile)))
    tile = (tile // sublane) * sublane
    # never make the block taller than the (sublane-rounded) row count
    tile = min(tile, _round_up(rows, sublane))
    return max(tile, sublane)


def rms_norm(x, weight, *, tile_rows=None):
    """Apply RMSNorm over the last axis of x. weight has shape (dim,)."""
    dim = x.shape[-1]
    assert weight.shape == (dim,)
    scale = float(dim) ** 0.5

    lead_shape = x.shape[:-1]
    rows = 1
    for s in lead_shape:
        rows *= s
    x2d = x.reshape(rows, dim)
    w2d = weight.reshape(1, dim)

    # Lane-dense feature dim: pad to a multiple of 128. Zero columns contribute
    # nothing to the sum of squares, so the norm is unchanged; padded output
    # columns are sliced off afterwards.
    dim_p = _round_up(dim, _LANE)
    if dim_p != dim:
        x2d = jnp.pad(x2d, ((0, 0), (0, dim_p - dim)))
        w2d = jnp.pad(w2d, ((0, 0), (0, dim_p - dim)))
        # TODO(synk): for tiny dims a rows-packing layout would avoid the
        # (dim_p/dim)x HBM traffic blow-up from padding; typical hidden sizes
        # are already multiples of 128 so padding is a no-op there.

    io_bytes = jnp.dtype(x.dtype).itemsize
    sublane = max(8, 32 // max(io_bytes, 1))  # 8 for f32, 16 for bf16, 32 for int8/fp8
    vmem_cap = _vmem_capacity_bytes()
    if tile_rows is None:
        tile_rows = _choose_tile_rows(rows, dim_p, io_bytes, vmem_cap, sublane)
    assert tile_rows % sublane == 0

    native_out_path = (x.dtype == jnp.bfloat16) and _supports_native_bf16_valu()

    grid = (pl.cdiv(rows, tile_rows),)
    vmem_limit = min(int(vmem_cap * 3 // 4), 96 * 1024 * 1024)

    kernel = lambda x_ref, w_ref, o_ref: _rmsnorm_kernel(
        x_ref, w_ref, o_ref, scale=scale, native_out_path=native_out_path
    )

    out = pl.pallas_call(
        kernel,
        out_shape=jax.ShapeDtypeStruct((rows, dim_p), x.dtype),
        grid=grid,
        in_specs=[
            pl.BlockSpec((tile_rows, dim_p), lambda i: (i, 0)),
            pl.BlockSpec((1, dim_p), lambda i: (0, 0)),
        ],
        out_specs=pl.BlockSpec((tile_rows, dim_p), lambda i: (i, 0)),
        compiler_params=pltpu.CompilerParams(
            dimension_semantics=("parallel",),   # shards rows across v7x's 2 TCs
            vmem_limit_bytes=vmem_limit,
        ),
    )(x2d, w2d)

    if dim_p != dim:
        out = out[:, :dim]
    return out.reshape(*lead_shape, dim)


if __name__ == "__main__":
    key = jax.random.PRNGKey(0)
    batch, seq, hidden = 2, 8, 32

    x = jax.random.normal(key, (batch, seq, hidden), dtype=jnp.float32)
    # nn.Parameter(torch.ones(dim)) -> deterministic ones init
    weight = jnp.ones((hidden,), dtype=jnp.float32)

    y = rms_norm(x, weight)
    jax.block_until_ready(y)

    # Reference check in plain JAX (same math as F.normalize * scale * weight).
    norm = jnp.sqrt(jnp.sum(x.astype(jnp.float32) ** 2, axis=-1, keepdims=True))
    ref = x / jnp.maximum(norm, _EPS) * (hidden ** 0.5) * weight
    assert jnp.allclose(y, ref, atol=2e-5, rtol=2e-5), "mismatch vs reference"

    print("KERNEL_OK")
</pallas_src>

<mosaic_0001>
module attributes {stable_mosaic.version = 11 : i64} {
  func.func @_lambda_(%arg0: i32, %arg1: memref<16x128xf32, #tpu.memory_space<vmem>>, %arg2: memref<1x128xf32, #tpu.memory_space<vmem>>, %arg3: memref<16x128xf32, #tpu.memory_space<vmem>>) attributes {dimension_semantics = [#tpu.dimension_semantics<parallel>], iteration_bounds = array<i64: 1>, scalar_prefetch = 0 : i64, scratch_operands = 0 : i64, tpu.core_type = #tpu.core_type<tc>, window_params = [{transform_indices = @transform_0, window_bounds = array<i64: 16, 128>}, {pipeline_mode = #tpu.pipeline_mode<synchronous>, transform_indices = @transform_1, window_bounds = array<i64: 1, 128>}, {transform_indices = @transform_2, window_bounds = array<i64: 16, 128>}]} {
    %c0 = arith.constant 0 : index
    %c0_0 = arith.constant 0 : index
    %0 = vector.load %arg1[%c0, %c0_0] : memref<16x128xf32, #tpu.memory_space<vmem>>, vector<16x128xf32>
    %1 = arith.mulf %0, %0 : vector<16x128xf32>
    %cst = arith.constant dense<0.000000e+00> : vector<16xf32>
    %2 = vector.multi_reduction <add>, %1, %cst [1] : vector<16x128xf32> to vector<16xf32>
    %3 = vector.shape_cast %2 : vector<16xf32> to vector<16x1xf32>
    %cst_1 = arith.constant 1.000000e-24 : f32
    %4 = vector.broadcast %cst_1 : f32 to vector<16x1xf32>
    %5 = arith.maximumf %3, %4 : vector<16x1xf32>
    %6 = math.rsqrt %5 : vector<16x1xf32>
    %cst_2 = arith.constant 5.65685415 : f32
    %7 = vector.broadcast %cst_2 : f32 to vector<16x1xf32>
    %8 = arith.mulf %7, %6 : vector<16x1xf32>
    %c0_3 = arith.constant 0 : index
    %c0_4 = arith.constant 0 : index
    %9 = vector.load %arg2[%c0_3, %c0_4] : memref<1x128xf32, #tpu.memory_space<vmem>>, vector<1x128xf32>
    %10 = vector.broadcast %8 : vector<16x1xf32> to vector<16x128xf32>
    %11 = arith.mulf %0, %10 : vector<16x128xf32>
    %12 = vector.broadcast %9 : vector<1x128xf32> to vector<16x128xf32>
    %13 = arith.mulf %11, %12 : vector<16x128xf32>
    %c0_5 = arith.constant 0 : index
    %c0_6 = arith.constant 0 : index
    %14 = vector.load %arg3[%c0_5, %c0_6] : memref<16x128xf32, #tpu.memory_space<vmem>>, vector<16x128xf32>
    tpu.vector_store %arg3[%c0_5, %c0_6], %13 {strides = array<i32>} : memref<16x128xf32, #tpu.memory_space<vmem>>, vector<16x128xf32>,
    return
  }
  func.func @transform_0(%arg0: i32) -> (i32, i32) {
    %c0_i32 = arith.constant 0 : i32
    %c0_i32_0 = arith.constant 0 : i32
    return %arg0, %c0_i32 : i32, i32
  }
  func.func @transform_1(%arg0: i32) -> (i32, i32) {
    %c0_i32 = arith.constant 0 : i32
    %c0_i32_0 = arith.constant 0 : i32
    %c0_i32_1 = arith.constant 0 : i32
    return %c0_i32, %c0_i32_0 : i32, i32
  }
  func.func @transform_2(%arg0: i32) -> (i32, i32) {
    %c0_i32 = arith.constant 0 : i32
    %c0_i32_0 = arith.constant 0 : i32
    return %arg0, %c0_i32 : i32, i32
  }
}

</mosaic_0001>

<bundles_post_ra>
// kernel: tpu_custom_call.1
= control target key start
LH: loop header
LB: loop body
LE: loop exit
PB: predicated region body
PF: predicated region fallthrough
CT: control target
= control target key end

     0   :  { %7 = vsyncpa [#allocation3], 0  ;;  %s179_s0 = inlined_call_operand.hbm [shape: f32[16,128], index: 0, kind: input, shape index: {}]   ;;  %s180_s1 = inlined_call_operand.vmem [shape: f32[1,128], index: 1, kind: input, shape index: {}]   ;;  %s181_s2 = inlined_call_operand.hbm [shape: f32[16,128], index: 2, kind: output, shape index: {}]  }
   0x1   :  { %8 = vsyncpa [#allocation4], 0  ;;  %s127_s9 = smov [#allocation2]   ;;  %s79_s13 = scalar_lea.hbm %s179_s0, 256 }
   0x2   :  { %s14_s10 = sshll.u32 %s127_s9, 4  ;;  %p80_p0 = scmp.ne.s32.totalorder %s179_s0, %s79_s13  ;;  %s15_s10 = int_to_ptr.vmem [resolvable:$true] %s14_s10 }
   0x3   :  { %p83_p1 = scmp.lt.u32.totalorder %s79_s13, %s179_s0 }
   0x5   :  { %p85_p2 = pnand %p83_p1, %p80_p0 }
   0x7   :  { %88 = shalt.err (!%p85_p2)
}
   0x8   :  { %s89_s18 = scalar_lea.vmem %s15_s10, 256  ;;  %p94_p4 = scmp.lt.s32.totalorder %s15_s10, %s15_s10 }
   0x9   :  { %p90_p3 = scmp.ne.s32.totalorder %s15_s10, %s89_s18  ;;  %p95_p5 = scmp.lt.s32.totalorder %s89_s18, %s89_s18 }
   0xb   :  { %p96_p6 = por %p95_p5, %p94_p4 }
   0xd   :  { %p97_p7 = pnand %p96_p6, %p90_p3 }
   0xf   :  { %100 = shalt.err (!%p97_p7)
}
  0x10   :  { %s128_s19 = smov 128   ;;  %s129_s20 = smov 8  }
  0x11   :  { %20 = dma.hbm_to_vmem [thread:$0]  %s179_s0, 256, %s15_s10, [#allocation3], %s128_s19, %s128_s19, %s129_s20  }
  0x12   :  { %123 = dma.done.wait [#allocation3], 256  }
  0x13   :  { %124 = vsyncadd [#allocation3], 4294967040  ;;  %v26_v0 = vld [vmem:[#allocation2] sm:$0xff]  ;;  %v27_v1 = vld [vmem:[#allocation2 + $0x8] sm:$0xff]  ;;  %s130_s0 = smov [#allocation5]  }
  0x14   :  { %v28_v2 = vmul.f32 %v26_v0, %v26_v0  ;;  %v29_v3 = vmul.f32 %v27_v1, %v27_v1  ;;  %v70_v10 = vld [vmem:[%s180_s1] ss:$0 sm:$0xff]  ;;  %s58_s25 = sshll.u32 %s130_s0, 4  ;;  %s59_s25 = int_to_ptr.vmem [resolvable:$true] %s58_s25 }
  0x15   :  { %s101_s26 = scalar_lea.vmem %s59_s25, 256  ;;  %p106_p9 = scmp.lt.s32.totalorder %s59_s25, %s59_s25 }
  0x16   :  { %30 = vadd.xlane.f32.xlu0 %v28_v2  ;;  %p102_p8 = scmp.ne.s32.totalorder %s59_s25, %s101_s26  ;;  %p107_p10 = scmp.lt.s32.totalorder %s101_s26, %s101_s26 }
  0x18   :  { %p108_p11 = por %p107_p10, %p106_p9 }
  0x1a   :  { %32 = vadd.xlane.f32.xlu0 %v29_v3  ;;  %p109_p12 = pnand %p108_p11, %p102_p8 }
  0xa3   :  { %v31_v4 = vpop.xlane.xlu0 %30 }
  0xa4   :  { %v34_v5 = vmax.f32 %v31_v4, 1e-24 }
  0xa6   :  { %75 = vrsqrt.f32 %v34_v5 }
  0xa7   :  { %v33_v6 = vpop.xlane.xlu0 %32 }
  0xa8   :  { %v35_v7 = vmax.f32 %v33_v6, 1e-24 }
  0xaa   :  { %77 = vrsqrt.f32 %v35_v7 }
  0xb0   :  { %v76_v8 = vpop.eup %75 }
  0xb1   :  { %v38_v9 = vmul.f32 5.656854, %v76_v8 }
  0xb3   :  { %v41_v11 = vmul.f32 %v38_v9, %v26_v0 }
  0xb4   :  { %v78_v12 = vpop.eup %77 }
  0xb5   :  { %v39_v13 = vmul.f32 5.656854, %v78_v12  ;;  %v49_v14 = vmul.f32 %v70_v10, %v41_v11 }
  0xb7   :  { %v42_v15 = vmul.f32 %v39_v13, %v27_v1  ;;  %51 = vst [vmem:[#allocation5] sm:$0xff] %v49_v14 }
  0xb9   :  { %v50_v16 = vmul.f32 %v70_v10, %v42_v15 }
  0xbb   :  { %52 = vst [vmem:[#allocation5 + $0x8] sm:$0xff] %v50_v16 }
  0xbc   :  { %112 = shalt.err (!%p109_p12)
}
  0xbd   :  { %s113_s28 = scalar_lea.hbm %s181_s2, 256 }
  0xbe   :  { %p114_p13 = scmp.ne.s32.totalorder %s181_s2, %s113_s28  ;;  %p117_p0 = scmp.lt.u32.totalorder %s113_s28, %s181_s2 }
  0xc0   :  { %p119_p1 = pnand %p117_p0, %p114_p13 }
  0xc2   :  { %122 = shalt.err (!%p119_p1)
}
  0xc3   :  { %64 = dma.vmem_to_hbm [thread:$0]  %s59_s25, 256, %s181_s2, [#allocation4], %s128_s19, %s128_s19, %s129_s20  }
  0xc4   :  { %125 = dma.done.wait [#allocation4], 256  }
  0xc5   :  { %126 = vsyncadd [#allocation4], 4294967040 }
  0xc6   :  { %68 = vsyncpa [#allocation3], 1 }
  0xc7   :  { %69 = vsyncpa [#allocation4], 1 }

</bundles_post_ra>
